<compile_context>
chip_gen: v5e
topology: v5e:2x2
jax: 0.10.0
libtpu: 0.0.40
codegen_flags: <defaults>
</compile_context>

<pallas_src>
import functools
import math

import jax
import jax.numpy as jnp
from jax import lax
from jax.experimental import pallas as pl
from jax.experimental.pallas import tpu as pltpu

_LANE = 128
_SUBLANE = 8


def _round_up(x, m):
    return (x + m - 1) // m * m


def _choose_block_m(M, block_m):
    """Sublane-aligned batch tile. Guarantees >=2 grid steps when M allows it so the
    'parallel' batch axis shards across v7x's two TensorCores (harmless on v5e/v6e)."""
    if M < _SUBLANE:
        return M                                    # full-extent block (legal: equals array dim)
    bm = min(block_m, M)
    half = (M // 2) // _SUBLANE * _SUBLANE
    if half >= _SUBLANE:
        bm = min(bm, half)                          # ensures cdiv(M, bm) >= 2
    return max(_SUBLANE, bm // _SUBLANE * _SUBLANE)


# ----------------------------------------------------------------------------
# fused kernel:  o = normalize( leaky_relu(s @ W1 + b1, 0.2) @ W2 + b2 , p=2, dim=1 )
# ----------------------------------------------------------------------------
def _generator_kernel(s_ref, w1_ref, b1_ref, w2_ref, b2_ref, o_ref, *, eps):
    h = jnp.dot(s_ref[...], w1_ref[...], preferred_element_type=jnp.float32) + b1_ref[...]
    h = jnp.where(h > 0, h, 0.2 * h)                      # LeakyReLU(0.2)
    y = jnp.dot(h, w2_ref[...], preferred_element_type=jnp.float32) + b2_ref[...]
    ss = jnp.sum(y * y, axis=-1, keepdims=True)           # per-row squared L2 norm
    inv = lax.rsqrt(jnp.maximum(ss, eps * eps))           # == 1 / max(||y||_2, eps)  (EUP slot)
    o_ref[...] = (y * inv).astype(o_ref.dtype)


def generator_forward(s, params, *, block_m=2048, eps=1e-12, interpret=False):
    """Forward pass of Generator. s: (M, nin) float32 -> (M, nout) float32."""
    w1, b1, w2, b2 = params["w1"], params["b1"], params["w2"], params["b2"]
    M, nin = s.shape
    nh = w1.shape[1]
    nout = w2.shape[1]

    # Lane-dense output: pad the second Linear to a multiple of 128 output columns.
    # Padded columns are exactly zero -> L2 row norm and the first nout columns unchanged.
    npad = _round_up(nout, _LANE)
    if npad != nout:
        w2p = jnp.pad(w2, ((0, 0), (0, npad - nout)))
        b2p = jnp.pad(b2, ((0, 0), (0, npad - nout)))
    else:
        w2p, b2p = w2, b2

    bm = _choose_block_m(M, block_m)
    grid = (pl.cdiv(M, bm),)

    const = lambda i: (0, 0)

    # Advisory cost estimate (helps XLA schedule around this launch-overhead-bound call).
    flops = 2 * M * nin * nh + 2 * M * nh * npad + 2 * M * nh + 5 * M * npad
    bytes_accessed = 4 * (M * nin + M * npad + nin * nh + nh + nh * npad + npad)
    cost = pl.CostEstimate(flops=flops, transcendentals=M, bytes_accessed=bytes_accessed)

    # VMEM budget: double-buffered activation tiles + resident weights + f32 intermediates.
    vmem_est = 4 * (2 * bm * nin + 2 * bm * npad
                    + nin * nh + nh + nh * npad + npad
                    + 2 * bm * max(nh, npad))
    vmem_limit = int(min(64 * 1024 * 1024, max(32 * 1024 * 1024, 2 * vmem_est)))

    kern = functools.partial(_generator_kernel, eps=eps)
    out = pl.pallas_call(
        kern,
        out_shape=jax.ShapeDtypeStruct((M, npad), jnp.float32),
        grid=grid,
        in_specs=[
            pl.BlockSpec((bm, nin), lambda i: (i, 0)),    # activations: tiled over batch
            pl.BlockSpec((nin, nh), const),               # weights/biases: resident, fetched once
            pl.BlockSpec((1, nh), const),
            pl.BlockSpec((nh, npad), const),
            pl.BlockSpec((1, npad), const),
        ],
        out_specs=pl.BlockSpec((bm, npad), lambda i: (i, 0)),
        compiler_params=pltpu.CompilerParams(
            dimension_semantics=("parallel",),
            vmem_limit_bytes=vmem_limit,
        ),
        cost_estimate=cost,
        interpret=interpret,
    )(s, w1, b1, w2p, b2p)

    return out if npad == nout else out[:, :nout]


# ----------------------------------------------------------------------------
# deterministic parameter init (xavier_uniform weights, zero biases)
# ----------------------------------------------------------------------------
def init_params(key, nin, nout, nh):
    k1, k2 = jax.random.split(key)

    def xavier(k, fan_in, fan_out):
        a = math.sqrt(6.0 / (fan_in + fan_out))
        return jax.random.uniform(k, (fan_in, fan_out), jnp.float32, -a, a)

    return {
        "w1": xavier(k1, nin, nh),
        "b1": jnp.zeros((1, nh), jnp.float32),
        "w2": xavier(k2, nh, nout),
        "b2": jnp.zeros((1, nout), jnp.float32),
    }


# ----------------------------------------------------------------------------
# pure-JAX reference (mirrors torch semantics: F.normalize clamps norm at 1e-12)
# ----------------------------------------------------------------------------
def generator_ref(s, params, eps=1e-12):
    h = s @ params["w1"] + params["b1"]
    h = jnp.where(h > 0, h, 0.2 * h)
    y = h @ params["w2"] + params["b2"]
    n = jnp.sqrt(jnp.sum(y * y, axis=1, keepdims=True))
    return y / jnp.maximum(n, eps)


# ----------------------------------------------------------------------------
if __name__ == "__main__":
    nin, nh, nout = 32, 64, 16

    key = jax.random.PRNGKey(0)
    k_par, k_s1, k_s2 = jax.random.split(key, 3)
    params = init_params(k_par, nin=nin, nout=nout, nh=nh)

    # divisible batch -> 2 grid steps (exercises pipelining + v7x megacore sharding)
    s1 = jax.random.normal(k_s1, (16, nin), jnp.float32)
    out1 = jax.block_until_ready(generator_forward(s1, params))
    assert out1.shape == (16, nout)
    assert jnp.allclose(out1, generator_ref(s1, params), rtol=1e-4, atol=1e-5), "mismatch (divisible M)"
    assert jnp.allclose(jnp.sum(out1 * out1, axis=1), 1.0, rtol=1e-4, atol=1e-4)

    # ragged batch -> cdiv grid with a masked partial last tile
    s2 = jax.random.normal(k_s2, (20, nin), jnp.float32)
    out2 = jax.block_until_ready(generator_forward(s2, params))
    assert out2.shape == (20, nout)
    assert jnp.allclose(out2, generator_ref(s2, params), rtol=1e-4, atol=1e-5), "mismatch (ragged M)"

    print("KERNEL_OK")
</pallas_src>

<mosaic_0001>
module attributes {stable_mosaic.version = 11 : i64} {
  func.func @_generator_kernel(%arg0: i32, %arg1: memref<8x32xf32, #tpu.memory_space<vmem>>, %arg2: memref<32x64xf32, #tpu.memory_space<vmem>>, %arg3: memref<1x64xf32, #tpu.memory_space<vmem>>, %arg4: memref<64x128xf32, #tpu.memory_space<vmem>>, %arg5: memref<1x128xf32, #tpu.memory_space<vmem>>, %arg6: memref<8x128xf32, #tpu.memory_space<vmem>>) attributes {dimension_semantics = [#tpu.dimension_semantics<parallel>], iteration_bounds = array<i64: 2>, scalar_prefetch = 0 : i64, scratch_operands = 0 : i64, tpu.core_type = #tpu.core_type<tc>, window_params = [{transform_indices = @transform_0, window_bounds = array<i64: 8, 32>}, {pipeline_mode = #tpu.pipeline_mode<synchronous>, transform_indices = @transform_1, window_bounds = array<i64: 32, 64>}, {pipeline_mode = #tpu.pipeline_mode<synchronous>, transform_indices = @transform_2, window_bounds = array<i64: 1, 64>}, {pipeline_mode = #tpu.pipeline_mode<synchronous>, transform_indices = @transform_3, window_bounds = array<i64: 64, 128>}, {pipeline_mode = #tpu.pipeline_mode<synchronous>, transform_indices = @transform_4, window_bounds = array<i64: 1, 128>}, {transform_indices = @transform_5, window_bounds = array<i64: 8, 128>}]} {
    %c0 = arith.constant 0 : index
    %c0_0 = arith.constant 0 : index
    %0 = vector.load %arg1[%c0, %c0_0] : memref<8x32xf32, #tpu.memory_space<vmem>>, vector<8x32xf32>
    %c0_1 = arith.constant 0 : index
    %c0_2 = arith.constant 0 : index
    %1 = vector.load %arg2[%c0_1, %c0_2] : memref<32x64xf32, #tpu.memory_space<vmem>>, vector<32x64xf32>
    %cst = arith.constant dense<0.000000e+00> : vector<8x64xf32>
    %2 = tpu.matmul %0, %1, %cst {dimension_numbers = #tpu.dot_dimension_numbers<[1], [0], [0], [1], [0, 0, 1, 1], [], []>} : vector<8x32xf32>, vector<32x64xf32>, vector<8x64xf32> -> vector<8x64xf32>
    %c0_3 = arith.constant 0 : index
    %c0_4 = arith.constant 0 : index
    %3 = vector.load %arg3[%c0_3, %c0_4] : memref<1x64xf32, #tpu.memory_space<vmem>>, vector<1x64xf32>
    %4 = vector.broadcast %3 : vector<1x64xf32> to vector<8x64xf32>
    %5 = arith.addf %2, %4 : vector<8x64xf32>
    %cst_5 = arith.constant 0.000000e+00 : f32
    %6 = vector.broadcast %cst_5 : f32 to vector<8x64xf32>
    %7 = arith.cmpf ogt, %5, %6 : vector<8x64xf32>
    %cst_6 = arith.constant 2.000000e-01 : f32
    %8 = vector.broadcast %cst_6 : f32 to vector<8x64xf32>
    %9 = arith.mulf %8, %5 : vector<8x64xf32>
    %10 = arith.select %7, %5, %9 : vector<8x64xi1>, vector<8x64xf32>
    %c0_7 = arith.constant 0 : index
    %c0_8 = arith.constant 0 : index
    %11 = vector.load %arg4[%c0_7, %c0_8] : memref<64x128xf32, #tpu.memory_space<vmem>>, vector<64x128xf32>
    %cst_9 = arith.constant dense<0.000000e+00> : vector<8x128xf32>
    %12 = tpu.matmul %10, %11, %cst_9 {dimension_numbers = #tpu.dot_dimension_numbers<[1], [0], [0], [1], [0, 0, 1, 1], [], []>} : vector<8x64xf32>, vector<64x128xf32>, vector<8x128xf32> -> vector<8x128xf32>
    %c0_10 = arith.constant 0 : index
    %c0_11 = arith.constant 0 : index
    %13 = vector.load %arg5[%c0_10, %c0_11] : memref<1x128xf32, #tpu.memory_space<vmem>>, vector<1x128xf32>
    %14 = vector.broadcast %13 : vector<1x128xf32> to vector<8x128xf32>
    %15 = arith.addf %12, %14 : vector<8x128xf32>
    %16 = arith.mulf %15, %15 : vector<8x128xf32>
    %cst_12 = arith.constant dense<0.000000e+00> : vector<8xf32>
    %17 = vector.multi_reduction <add>, %16, %cst_12 [1] : vector<8x128xf32> to vector<8xf32>
    %18 = vector.shape_cast %17 : vector<8xf32> to vector<8x1xf32>
    %cst_13 = arith.constant 1.000000e-24 : f32
    %19 = vector.broadcast %cst_13 : f32 to vector<8x1xf32>
    %20 = arith.maximumf %18, %19 : vector<8x1xf32>
    %21 = math.rsqrt %20 : vector<8x1xf32>
    %22 = vector.broadcast %21 : vector<8x1xf32> to vector<8x128xf32>
    %23 = arith.mulf %15, %22 : vector<8x128xf32>
    %c0_14 = arith.constant 0 : index
    %c0_15 = arith.constant 0 : index
    %24 = vector.load %arg6[%c0_14, %c0_15] : memref<8x128xf32, #tpu.memory_space<vmem>>, vector<8x128xf32>
    tpu.vector_store %arg6[%c0_14, %c0_15], %23 {strides = array<i32>} : memref<8x128xf32, #tpu.memory_space<vmem>>, vector<8x128xf32>,
    return
  }
  func.func @transform_0(%arg0: i32) -> (i32, i32) {
    %c0_i32 = arith.constant 0 : i32
    %c0_i32_0 = arith.constant 0 : i32
    return %arg0, %c0_i32 : i32, i32
  }
  func.func @transform_1(%arg0: i32) -> (i32, i32) {
    %c0_i32 = arith.constant 0 : i32
    %c0_i32_0 = arith.constant 0 : i32
    %c0_i32_1 = arith.constant 0 : i32
    return %c0_i32, %c0_i32_0 : i32, i32
  }
  func.func @transform_2(%arg0: i32) -> (i32, i32) {
    %c0_i32 = arith.constant 0 : i32
    %c0_i32_0 = arith.constant 0 : i32
    %c0_i32_1 = arith.constant 0 : i32
    return %c0_i32, %c0_i32_0 : i32, i32
  }
  func.func @transform_3(%arg0: i32) -> (i32, i32) {
    %c0_i32 = arith.constant 0 : i32
    %c0_i32_0 = arith.constant 0 : i32
    %c0_i32_1 = arith.constant 0 : i32
    return %c0_i32, %c0_i32_0 : i32, i32
  }
  func.func @transform_4(%arg0: i32) -> (i32, i32) {
    %c0_i32 = arith.constant 0 : i32
    %c0_i32_0 = arith.constant 0 : i32
    %c0_i32_1 = arith.constant 0 : i32
    return %c0_i32, %c0_i32_0 : i32, i32
  }
  func.func @transform_5(%arg0: i32) -> (i32, i32) {
    %c0_i32 = arith.constant 0 : i32
    %c0_i32_0 = arith.constant 0 : i32
    return %arg0, %c0_i32 : i32, i32
  }
}

</mosaic_0001>

<bundles_post_ra>
// kernel: tpu_custom_call.1
= control target key start
LH: loop header
LB: loop body
LE: loop exit
PB: predicated region body
PF: predicated region fallthrough
CT: control target
= control target key end

     0   :  { %10 = vsyncpa [#allocation3], 0  ;;  %s910_s0 = inlined_call_operand.hbm [shape: f32[16,32], index: 0, kind: input, shape index: {}]   ;;  %s911_s1 = inlined_call_operand.hbm [shape: f32[32,64], index: 1, kind: input, shape index: {}]   ;;  %s912_s2 = inlined_call_operand.vmem [shape: f32[1,64], index: 2, kind: input, shape index: {}]   ;;  %s913_s3 = inlined_call_operand.hbm [shape: f32[64,128], index: 3, kind: input, shape index: {}]   ;;  %s914_s4 = inlined_call_operand.vmem [shape: f32[1,128], index: 4, kind: input, shape index: {}]   ;;  %s915_s5 = inlined_call_operand.hbm [shape: f32[16,128], index: 5, kind: output, shape index: {}]  }
   0x1   :  { %12 = vsyncpa [#allocation3 + $0x1], 0 }
   0x2   :  { %13 = vsyncpa [#allocation6], 0 }
   0x3   :  { %14 = vsyncpa [#allocation4], 0 }
   0x4   :  { %16 = vsyncpa [#allocation4 + $0x1], 0  ;;  %s755_s18 = smov 0   ;;  %s757_s19 = smov 0  }
   0x5   :  { %s759_s20 = smov 0   ;;  %s761_s21 = smov 0  }
   0x6 LB: > { %s174_s24 = sshll.u32 %s911_s1, 4  ;;  %s779_s25 = sadd.s32 4294967295, %s719_s21   ;;  %s719_s21 = sphi %s761_s21, %s926_s21   ;;  %s715_s20 = sphi %s759_s20, %s925_s20   ;;  %s711_s19 = sphi %s757_s19, %s924_s19   ;;  %s707_s18 = sphi %s755_s18, %s923_s18   ;;  %s175_s24 = int_to_ptr.hbm [resolvable:$true] %s174_s24 }
   0x7   : > { %p469_p0 = scmp.ge.s32.totalorder %s719_s21, 1  ;;  %p43_p1 = scmp.eq.s32.totalorder %s779_s25, 0 }
   0x8   : > { %p163_p2 = scmp.lt.s32.totalorder %s719_s21, 3  ;;  %s721_s27 = smov [#allocation5]  }
   0x9   : > { %s176_s28 = sshll.u32 %s721_s27, 4  ;;  %s191_s6 = sshll.u32 %s913_s3, 4  ;;  %s177_s28 = int_to_ptr.vmem [resolvable:$true] %s176_s28  ;;  %s192_s6 = int_to_ptr.hbm [resolvable:$true] %s191_s6 }
   0xa   : > { %p784_p3 = pnand %p469_p0, %p163_p2  ;;  %s722_s7 = smov [#allocation7]  }
   0xb   : > { %s193_s8 = sshll.u32 %s722_s7, 4  ;;  %s723_s9 = smov 128   ;;  %s194_s8 = int_to_ptr.vmem [resolvable:$true] %s193_s8 }
   0xc   : > { %p498_p4 = pneg %p784_p3  ;;  %s724_s10 = smov 8  }
   0xd   : > { %s468_s11 = sadd.s32 4294967294, %s719_s21   ;;  %s798_s12 = sadd.s32 1, %s719_s21  }
   0xe   : > { %p499_p6 = pnand %p498_p4, %p43_p1  ;;  %s26_s13 = ssub.s32 %s719_s21, %s798_s12 }
   0xf   : > { %s29_s14 = sadd.s32 1, %s715_s20  ;;  %p27_p7 = scmp.eq.s32.totalorder %s26_s13, 0 }
  0x10   : > { %501 = dma.hbm_to_vmem [thread:$0]  (!%p499_p6), %s175_s24, 512, %s177_s28, [#allocation6], %s723_s9, %s723_s9, %s724_s10  }
  0x11   : > { %504 = dma.hbm_to_vmem [thread:$0]  (!%p499_p6), %s192_s6, 1024, %s194_s8, [#allocation6], %s723_s9, %s723_s9, %s724_s10  }
  0x12   : > { %p36_p8 = scmp.ne.s32.totalorder %s715_s20, %s711_s19  ;;  %p37_p9 = scmp.eq.s32.totalorder %s719_s21, 0 }
  0x13   : > { %p42_p10 = scmp.ne.s32.totalorder %s711_s19, %s707_s18  ;;  %p150_p13 = scmp.eq.s32.totalorder %s779_s25, 1 }
  0x14   : > { %s809_s15 = scalar_select %p27_p7, %s715_s20, %s29_s14  }
  0x15   : > { %p811_p11 = por %p37_p9, %p36_p8  ;;  %p817_p12 = por %p43_p1, %p42_p10 }
  0x16   : > { %p156_p0 = scmp.eq.s32.totalorder %s468_s11, 1  ;;  %p515_p2 = scmp.lt.s32.totalorder %s719_s21, 2 }
  0x17   : > { %s210_s22 = sand.u32 1, %s715_s20   ;;  %p824_p4 = por %p150_p13, %p36_p8 }
  0x18   : > { %p828_p6 = por %p156_p0, %p42_p10  ;;  %s473_s27 = sshll.u32 %s210_s22, 3 }
  0x19   : > { %s474_s28 = sshll.u32 %s719_s21, 3  ;;  %s214_s7 = scalar_lea.vmem [#allocation2], %s473_s27 }
  0x1a   : > { %s218_s6 = scalar_lea.hbm %s910_s0, %s474_s28  ;;  %s222_s8 = sshll.u32 %s214_s7, 4  ;;  %s223_s8 = int_to_ptr.vmem [resolvable:$true] %s222_s8 }
  0x1b   : > { %s220_s9 = sshll.u32 %s218_s6, 4  ;;  %p838_p7 = pnand %p515_p2, %p811_p11  ;;  %s221_s9 = int_to_ptr.hbm [resolvable:$true] %s220_s9 }
  0x1c   : > { %s211_s11 = scalar_lea.sflag [#allocation3], %s210_s22  ;;  %s619_s13 = sshra.s32 %s221_s9, 4  ;;  %s620_s13 = int_to_ptr.hbm [resolvable:$true] %s619_s13 }
  0x1d   : > { %s621_s14 = scalar_lea.hbm %s620_s13, 8  ;;  %p623_p9 = pneg %p838_p7 }
  0x1e   : > { %p622_p8 = scmp.ne.s32.totalorder %s620_s13, %s621_s14  ;;  %s626_s29 = scalar_lea.hbm %s910_s0, 16 }
  0x1f   : > { %p627_p11 = scmp.lt.s32.totalorder %s620_s13, %s910_s0  ;;  %p628_p0 = scmp.lt.s32.totalorder %s626_s29, %s621_s14 }
  0x20   : > { %p624_p10 = pnand %p623_p9, %p622_p8 }
  0x21   : > { %p629_p2 = por %p628_p0, %p627_p11 }
  0x22   : > { %p625_p13 = pneg %p624_p10 }
  0x24   : > { %p630_p5 = pnand %p629_p2, %p625_p13 }
  0x26   : > { %633 = shalt.err (!%p630_p5)
}
  0x27   : > { %508 = dma.hbm_to_vmem [thread:$0]  (!%p838_p7), %s221_s9, 128, %s223_s8, %s211_s11  }
  0x28   : > { %231 = sbr.rel (%p784_p3) target bundleno = 458 (0x1ca), region = 40  ;;  %s855_s22 = sand.u32 (!%p784_p3), 1, %s711_s19  }
  0x29   : > { %s476_s6 = sshll.u32 (!%p784_p3), %s855_s22, 3  ;;  %s234_s7 = scalar_lea.sflag (!%p784_p3), [#allocation3], %s855_s22 }
  0x2a   : > { %s237_s13 = scalar_lea.vmem (!%p784_p3), [#allocation2], %s476_s6 }
  0x2d   : > { %694 = dma.done.wait (%p817_p12), %s234_s7, 128  }
  0x2e   : > { %696 = vsyncadd (%p817_p12), %s234_s7, 4294967168 }
  0x2f   : > { %698 = dma.done.wait (%p43_p1), [#allocation6], 1536  }
  0x30   : > { %700 = vsyncadd (%p43_p1), [#allocation6], 4294965760  ;;  %v279_v0 = vld [vmem:[#allocation5 + $0x18] sm:$0xff]  ;;  %v278_v1 = vld [vmem:[#allocation5 + $0x10] sm:$0xff]  ;;  %vm284_vm0 = vcmask 261120   ;;  %vm323_vm2 = vcmask 523264  }
  0x31   : > { %300 = vmatpush.msra.mxu0 %v279_v0  ;;  %v318_v2 = vld [vmem:[#allocation7 + $0x38] sm:$0xff]  ;;  %v277_v3 = vld [vmem:[#allocation5 + $0x8] sm:$0xff]  ;;  %v317_v4 = vld [vmem:[#allocation7 + $0x30] sm:$0xff]  ;;  %s483_s10 = sshll.u32 %s779_s25, 3  ;;  %s274_s28 = scalar_lea.vmem [#allocation8], %s476_s6 }
  0x32   : > { %335 = vmatpush.msra.mxu1 %v318_v2  ;;  %v316_v5 = vld [vmem:[#allocation7 + $0x28] sm:$0xff]  ;;  %v276_v6 = vld [vmem:[#allocation5] sm:$0xff]  ;;  %v275_v7 = vld [vmem:[%s237_s13] sm:$0xff]  ;;  %s374_s27 = scalar_lea.hbm %s915_s5, %s483_s10  ;;  %s376_s29 = sshll.u32 %s274_s28, 4  ;;  %s377_s29 = int_to_ptr.vmem [resolvable:$true] %s376_s29 }
  0x33   : > { %301 = vmatpush.msra.mxu0 %v278_v1  ;;  %v315_v8 = vld [vmem:[#allocation7 + $0x20] sm:$0xff]  ;;  %v314_v9 = vld [vmem:[#allocation7 + $0x18] sm:$0xff]  ;;  %v313_v10 = vld [vmem:[#allocation7 + $0x10] sm:$0xff]  ;;  %s378_s30 = sshll.u32 %s374_s27, 4  ;;  %s364_s25 = scalar_lea.sflag [#allocation4], %s855_s22  ;;  %s379_s30 = int_to_ptr.hbm [resolvable:$true] %s378_s30 }
  0x34   : > { %336 = vmatpush.msra.mxu1 %v317_v4  ;;  %v312_v11 = vld [vmem:[#allocation7 + $0x8] sm:$0xff]  ;;  %v311_v12 = vld [vmem:[#allocation7] sm:$0xff]  ;;  %v555_v13 = vld [vmem:[%s912_s2] ss:$0 sm:$0xff]  ;;  %s663_s16 = sshra.s32 %s379_s30, 4  ;;  %s669_s6 = scalar_lea.hbm %s915_s5, 16  ;;  %s664_s16 = int_to_ptr.hbm [resolvable:$true] %s663_s16 }
  0x35   : > { %302 = vmatpush.msra.mxu0 %v277_v3  ;;  %v556_v18 = vld [vmem:[%s914_s4] ss:$0 sm:$0xff]  ;;  %s665_s7 = scalar_lea.hbm %s664_s16, 8  ;;  %p670_p12 = scmp.lt.s32.totalorder %s664_s16, %s915_s5 }
  0x36   : > { %337 = vmatpush.msra.mxu1 %v316_v5  ;;  %p666_p1 = scmp.ne.s32.totalorder %s664_s16, %s665_s7  ;;  %p671_p7 = scmp.lt.s32.totalorder %s669_s6, %s665_s7 }
  0x37   : > { %303 = vmatpush.msra.mxu0 %v276_v6 }
  0x38   : > { %480 = vmatmul.msk.f32.vlgmr.msra.gmra.mxu0 %vm284_vm0, %v275_v7  ;;  %338 = vmatpush.msra.mxu1 %v315_v8  ;;  %p667_p3 = pnand %p666_p1, %p824_p4  ;;  %p672_p8 = por %p671_p7, %p670_p12 }
  0x3a   : > { %339 = vmatpush.msra.mxu1 %v314_v9  ;;  %p668_p5 = pneg %p667_p3 }
  0x3c   : > { %340 = vmatpush.msra.mxu1 %v313_v10  ;;  %p673_p9 = pnand %p672_p8, %p668_p5 }
  0x3e   : > { %341 = vmatpush.msra.mxu1 %v312_v11 }
  0x40   : > { %342 = vmatpush.msra.mxu1 %v311_v12 }
  0xb5   : > { %v305_v14 = vpop.f32.mrf.mxu0 }
  0xb6   : > { %v306_v15 = vadd.f32 %v555_v13, %v305_v14 }
  0xb8   : > { %v309_v16 = vmul.f32 0.2, %v306_v15  ;;  %vm308_vm1 = vcmp.gt.f32.partialorder %v306_v15, 0.0 }
  0xba   : > { %v310_v17 = vsel %vm308_vm1, %v306_v15, %v309_v16 }
  0xbb   : > { %481 = vmatmul.msk.f32.vlgmr.msra.gmra.mxu1 %vm323_vm2, %v310_v17 }
 0x138   : > { %v344_v19 = vpop.f32.mrf.mxu1 }
 0x139   : > { %v345_v20 = vadd.f32 %v556_v18, %v344_v19 }
 0x13b   : > { %v347_v21 = vmul.f32 %v345_v20, %v345_v20 }
 0x13d   : > { %348 = vadd.xlane.f32.xlu0 %v347_v21 }
 0x1b0   : > { %v349_v22 = vpop.xlane.xlu0 %348 }
 0x1b1   : > { %v350_v23 = vmax.f32 %v349_v22, 1e-24 }
 0x1b3   : > { %557 = vrsqrt.f32 %v350_v23  ;;  %vm357_vm4 = vweird.f32 %v350_v23 }
 0x1b9   : > { %v558_v24 = vpop.eup %557 }
 0x1ba   : > { %v352_v25 = vmul.f32 %v558_v24, %v350_v23  ;;  %vm358_vm3 = vweird.f32 %v558_v24 }
 0x1bb   : > { %vm359_vm5 = vmor %vm357_vm4, %vm358_vm3 }
 0x1bc   : > { %v353_v26 = vmul.f32 %v558_v24, %v352_v25 }
 0x1be   : > { %v354_v27 = vmul.f32 0.5, %v353_v26 }
 0x1c0   : > { %v355_v28 = vsub.f32 1.5, %v354_v27 }
 0x1c2   : > { %v356_v29 = vmul.f32 %v558_v24, %v355_v28 }
 0x1c4   : > { %v360_v30 = vsel %vm359_vm5, %v558_v24, %v356_v29 }
 0x1c5   : > { %v361_v31 = vmul.f32 %v360_v30, %v345_v20 }
 0x1c7   : > { %362 = vst [vmem:[%s274_s28] sm:$0xff] %v361_v31 }
 0x1c8   : > { %676 = shalt.err (!%p673_p9)
}
 0x1c9   : > { %496 = dma.vmem_to_hbm [thread:$0]  (%p824_p4), %s377_s29, 128, %s379_s30, %s364_s25  }
 0x1ca PF: > { %s390_s22 = sand.u32 1, %s707_s18   ;;  %p922_p10 = scmp.ge.s32.totalorder %s719_s21, 2 }
 0x1cb   : > { %s391_s9 = scalar_lea.sflag [#allocation4], %s390_s22 }
 0x1cc   : > { %p510_p13 = pnand %p922_p10, %p828_p6 }
 0x1ce   : > { %p511_p11 = pneg %p510_p13 }
 0x1d0   : > { %702 = dma.done.wait (%p511_p11), %s391_s9, 128  }
 0x1d1   : > { %704 = vsyncadd (%p511_p11), %s391_s9, 4294967168  ;;  %p19_p0 = scmp.ge.s32.totalorder %s798_s12, 4   ;;  %s923_s18 = smov %s711_s19 }
 0x1d2   : > { %s924_s19 = smov %s715_s20  ;;  %s925_s20 = smov %s809_s15 }
 0x1d3   : > { %s926_s21 = smov %s798_s12  ;;  %21 = sbr.rel (!%p19_p0) target bundleno = 6 (0x6), region = 93 }
 0x1d8   :  { %397 = vsyncpa [#allocation3], 1 }
 0x1d9   :  { %399 = vsyncpa [#allocation3 + $0x1], 1 }
 0x1da   :  { %400 = vsyncpa [#allocation6], 1 }
 0x1db   :  { %401 = vsyncpa [#allocation4], 1 }
 0x1dc   :  { %403 = vsyncpa [#allocation4 + $0x1], 1 }

</bundles_post_ra>
